<compile_context>
chip_gen: v7x
topology: tpu7x:2x2x1
jax: 0.10.0
libtpu: 0.0.40
codegen_flags: <defaults>
</compile_context>

<pallas_src>
import functools

import jax
import jax.numpy as jnp
from jax.experimental import pallas as pl
from jax.experimental.pallas import tpu as pltpu


# ----------------------------------------------------------------------------
# Kernel: in-VMEM im2col assembly + (Cout, 27)@(27, Ho*Wo) matmul + BN bias
#         + LeakyReLU(0.01).  One image per grid step.
# ----------------------------------------------------------------------------
def _conv_bn_lrelu_kernel(w_ref, b_ref, t_ref, o_ref, patch_ref, *,
                          cin, k, stride, ho, wo):
    # w_ref:     (Cout, Cin*k*k)            f32  BN-scale-folded conv weight
    # b_ref:     (Cout, 1)                  f32  folded BN bias
    # t_ref:     (stride*k, Cin, rows*Wo)   bf16 tap-source groups (this image)
    # o_ref:     (Cout, Ho*Wo)              f32  output (flattened NCHW spatial)
    # patch_ref: (Cin*k*k, Ho*Wo)           f32  VMEM scratch: im2col, never in HBM
    p = ho * wo
    for di in range(k):
        dr, row_off = di % stride, di // stride      # row parity / row offset
        for dj in range(k):
            a = dr * k + dj                          # tap-source group index
            t = di * k + dj                          # patch / weight tap index
            patch_ref[t * cin:(t + 1) * cin, :] = (
                t_ref[a, :, row_off * wo: row_off * wo + p].astype(jnp.float32))
    y = jnp.dot(w_ref[...], patch_ref[...], preferred_element_type=jnp.float32)
    y = y + b_ref[...]
    o_ref[...] = jnp.where(y > 0, y, 0.01 * y).astype(o_ref.dtype)   # LeakyReLU


def _conv_bn_lrelu(taps, w_mat, bias, *, cout, cin, k, stride, ho, wo):
    n, n_groups, _, lflat = taps.shape
    p = ho * wo
    kernel = functools.partial(_conv_bn_lrelu_kernel,
                               cin=cin, k=k, stride=stride, ho=ho, wo=wo)
    return pl.pallas_call(
        kernel,
        out_shape=jax.ShapeDtypeStruct((n, cout, p), jnp.float32),
        grid_spec=pltpu.PrefetchScalarGridSpec(
            num_scalar_prefetch=0,
            grid=(n,),
            in_specs=[
                # tiny grid-invariant operands: whole-array blocks, constant index
                pl.BlockSpec((cout, cin * k * k), lambda i: (0, 0)),
                pl.BlockSpec((cout, 1), lambda i: (0, 0)),
                # per-image bf16 tap-source block (leading batch dim squeezed)
                pl.BlockSpec((None, n_groups, cin, lflat), lambda i: (i, 0, 0, 0)),
            ],
            out_specs=pl.BlockSpec((None, cout, p), lambda i: (i, 0, 0)),
            scratch_shapes=[pltpu.VMEM((cin * k * k, p), jnp.float32)],
        ),
        compiler_params=pltpu.CompilerParams(
            # batch axis is parallel: with N >= 2 both v7x TensorCores get work
            dimension_semantics=("parallel",)),
    )(w_mat, bias, taps)


# ----------------------------------------------------------------------------
# Host-side rearrangement: stride-phase "tap source" groups (bf16, ~1.5x input
# element count) so the kernel can build im2col patches with contiguous slices.
# ----------------------------------------------------------------------------
def _build_tap_sources(x_nchw, k=3, stride=2, pad=1):
    n, c, h, w = x_nchw.shape
    ho = (h + 2 * pad - k) // stride + 1
    wo = (w + 2 * pad - k) // stride + 1
    rows = ho + (k - 1) // stride            # rows kept per group (Ho+1 for k3/s2)
    need_h = (stride - 1) + stride * (rows - 1) + 1
    need_w = (k - 1) + stride * (wo - 1) + 1
    extra_h = max(0, need_h - (h + 2 * pad))
    extra_w = max(0, need_w - (w + 2 * pad))
    xb = x_nchw.astype(jnp.bfloat16)         # activations stream to HBM as bf16
    xp = jnp.pad(xb, ((0, 0), (0, 0), (pad, pad + extra_h), (pad, pad + extra_w)))
    groups = []
    for dr in range(stride):                 # row parity
        for dj in range(k):                  # column tap
            groups.append(
                xp[:, :, dr: dr + stride * (rows - 1) + 1: stride,
                         dj: dj + stride * (wo - 1) + 1: stride])  # (n,c,rows,wo)
    taps = jnp.stack(groups, axis=1)                     # (n, stride*k, c, rows, wo)
    taps = taps.reshape(n, stride * k, c, rows * wo)     # row-major flat spatial
    return taps, ho, wo


# ----------------------------------------------------------------------------
# encoder.conv1 block: Conv2d(3,16,k=3,s=2,p=1,bias=False) + BN(16) + LeakyReLU
#                      + Dropout2d(0.1) (eval mode => identity)
# ----------------------------------------------------------------------------
def encoder_conv1_block(x_nchw, params):
    w = params["conv_w"]                     # (Cout, Cin, 3, 3) PyTorch layout
    gamma, beta = params["bn_gamma"], params["bn_beta"]
    mean, var, eps = params["bn_mean"], params["bn_var"], params["bn_eps"]
    cout, cin, k, _ = w.shape
    stride = 2
    n = x_nchw.shape[0]

    taps, ho, wo = _build_tap_sources(x_nchw, k=k, stride=stride, pad=1)

    inv_std = 1.0 / jnp.sqrt(var + eps)
    scale = gamma * inv_std                                  # (Cout,)
    # column order (di, dj, cin) matches the kernel's patch row order t*cin + c
    w_mat = (w.transpose(0, 2, 3, 1).reshape(cout, k * k * cin)
             * scale[:, None]).astype(jnp.float32)
    bias = (beta - mean * scale).reshape(cout, 1).astype(jnp.float32)

    out = _conv_bn_lrelu(taps, w_mat, bias, cout=cout, cin=cin, k=k,
                         stride=stride, ho=ho, wo=wo)        # (N, Cout, Ho*Wo)
    return out.reshape(n, cout, ho, wo)                      # free reshape -> NCHW


# ----------------------------------------------------------------------------
# AE.forward
# ----------------------------------------------------------------------------
@jax.jit
def ae_forward(x_nchw, params):
    x1 = encoder_conv1_block(x_nchw, params)
    # TODO(synk): the reference AE.forward applies encoder.conv1 to its own output
    # 9 more times; those applications feed a 16-channel tensor into a Conv2d with
    # in_channels=3 and raise a runtime error in PyTorch, so they are not emulated.
    return x1


def make_params(key):
    kw, = jax.random.split(key, 1)
    cout, cin, k = 16, 3, 3
    fan_in = cin * k * k
    bound = 1.0 / jnp.sqrt(fan_in)
    conv_w = jax.random.uniform(kw, (cout, cin, k, k), jnp.float32,
                                minval=-bound, maxval=bound)
    gamma = 1.0 + 0.05 * jnp.arange(cout, dtype=jnp.float32)
    beta = 0.01 * jnp.arange(cout, dtype=jnp.float32)
    mean = 0.02 * jnp.arange(cout, dtype=jnp.float32) - 0.1
    var = 1.0 + 0.03 * jnp.arange(cout, dtype=jnp.float32)
    return dict(conv_w=conv_w, bn_gamma=gamma, bn_beta=beta,
                bn_mean=mean, bn_var=var, bn_eps=jnp.float32(1e-5))


def _reference(x, params):
    """Pure-JAX reference (lax conv) for a correctness check."""
    w = params["conv_w"]
    y = jax.lax.conv_general_dilated(
        x, w, window_strides=(2, 2), padding=((1, 1), (1, 1)),
        dimension_numbers=("NCHW", "OIHW", "NCHW"))
    inv_std = 1.0 / jnp.sqrt(params["bn_var"] + params["bn_eps"])
    scale = (params["bn_gamma"] * inv_std)[None, :, None, None]
    bias = (params["bn_beta"] - params["bn_mean"] * params["bn_gamma"] * inv_std)[
        None, :, None, None]
    y = y * scale + bias
    return jnp.where(y > 0, y, 0.01 * y)


if __name__ == "__main__":
    key = jax.random.PRNGKey(0)
    kx, kp = jax.random.split(key)
    x = jax.random.normal(kx, (2, 3, 16, 16), jnp.float32)   # NCHW, small shapes
    params = make_params(kp)

    out = jax.block_until_ready(ae_forward(x, params))

    # Reference on the bf16-rounded input (the kernel streams activations as bf16,
    # weights/accumulation stay f32), so input rounding cancels in the comparison.
    x_bf = x.astype(jnp.bfloat16).astype(jnp.float32)
    ref = _reference(x_bf, params)

    assert out.shape == (2, 16, 8, 8), out.shape
    max_err = float(jnp.max(jnp.abs(out - ref)))
    assert jnp.allclose(out, ref, atol=5e-3, rtol=5e-3), max_err

    print("KERNEL_OK")
</pallas_src>

<mosaic_0001>
module attributes {stable_mosaic.version = 11 : i64} {
  func.func @_conv_bn_lrelu_kernel(%arg0: i32, %arg1: memref<16x27xf32, #tpu.memory_space<vmem>>, %arg2: memref<16x1xf32, #tpu.memory_space<vmem>>, %arg3: memref<1x6x3x72xbf16, #tpu.memory_space<vmem>>, %arg4: memref<1x16x64xf32, #tpu.memory_space<vmem>>, %arg5: memref<27x64xf32, #tpu.memory_space<vmem>>) attributes {dimension_semantics = [#tpu.dimension_semantics<parallel>], iteration_bounds = array<i64: 2>, scalar_prefetch = 0 : i64, scratch_operands = 1 : i64, tpu.core_type = #tpu.core_type<tc>, window_params = [{pipeline_mode = #tpu.pipeline_mode<synchronous>, transform_indices = @transform_0, window_bounds = array<i64: 16, 27>}, {pipeline_mode = #tpu.pipeline_mode<synchronous>, transform_indices = @transform_1, window_bounds = array<i64: 16, 1>}, {transform_indices = @transform_2, window_bounds = array<i64: 1, 6, 3, 72>}, {transform_indices = @transform_3, window_bounds = array<i64: 1, 16, 64>}]} {
    %c0 = arith.constant 0 : index
    %c0_0 = arith.constant 0 : index
    %c0_1 = arith.constant 0 : index
    %c0_2 = arith.constant 0 : index
    %0 = vector.load %arg3[%c0, %c0_0, %c0_1, %c0_2] : memref<1x6x3x72xbf16, #tpu.memory_space<vmem>>, vector<1x1x3x64xbf16>
    %1 = vector.shape_cast %0 : vector<1x1x3x64xbf16> to vector<3x64xbf16>
    %2 = arith.extf %1 : vector<3x64xbf16> to vector<3x64xf32>
    %c0_3 = arith.constant 0 : index
    %c0_4 = arith.constant 0 : index
    %3 = vector.load %arg5[%c0_3, %c0_4] : memref<27x64xf32, #tpu.memory_space<vmem>>, vector<3x64xf32>
    tpu.vector_store %arg5[%c0_3, %c0_4], %2 {strides = array<i32>} : memref<27x64xf32, #tpu.memory_space<vmem>>, vector<3x64xf32>,
    %c0_5 = arith.constant 0 : index
    %c1 = arith.constant 1 : index
    %c0_6 = arith.constant 0 : index
    %c0_7 = arith.constant 0 : index
    %4 = vector.load %arg3[%c0_5, %c1, %c0_6, %c0_7] : memref<1x6x3x72xbf16, #tpu.memory_space<vmem>>, vector<1x1x3x64xbf16>
    %5 = vector.shape_cast %4 : vector<1x1x3x64xbf16> to vector<3x64xbf16>
    %6 = arith.extf %5 : vector<3x64xbf16> to vector<3x64xf32>
    %c3 = arith.constant 3 : index
    %c0_8 = arith.constant 0 : index
    %7 = vector.load %arg5[%c3, %c0_8] : memref<27x64xf32, #tpu.memory_space<vmem>>, vector<3x64xf32>
    tpu.vector_store %arg5[%c3, %c0_8], %6 {strides = array<i32>} : memref<27x64xf32, #tpu.memory_space<vmem>>, vector<3x64xf32>,
    %c0_9 = arith.constant 0 : index
    %c2 = arith.constant 2 : index
    %c0_10 = arith.constant 0 : index
    %c0_11 = arith.constant 0 : index
    %8 = vector.load %arg3[%c0_9, %c2, %c0_10, %c0_11] : memref<1x6x3x72xbf16, #tpu.memory_space<vmem>>, vector<1x1x3x64xbf16>
    %9 = vector.shape_cast %8 : vector<1x1x3x64xbf16> to vector<3x64xbf16>
    %10 = arith.extf %9 : vector<3x64xbf16> to vector<3x64xf32>
    %c6 = arith.constant 6 : index
    %c0_12 = arith.constant 0 : index
    %11 = vector.load %arg5[%c6, %c0_12] : memref<27x64xf32, #tpu.memory_space<vmem>>, vector<3x64xf32>
    tpu.vector_store %arg5[%c6, %c0_12], %10 {strides = array<i32>} : memref<27x64xf32, #tpu.memory_space<vmem>>, vector<3x64xf32>,
    %c0_13 = arith.constant 0 : index
    %c3_14 = arith.constant 3 : index
    %c0_15 = arith.constant 0 : index
    %c0_16 = arith.constant 0 : index
    %12 = vector.load %arg3[%c0_13, %c3_14, %c0_15, %c0_16] : memref<1x6x3x72xbf16, #tpu.memory_space<vmem>>, vector<1x1x3x64xbf16>
    %13 = vector.shape_cast %12 : vector<1x1x3x64xbf16> to vector<3x64xbf16>
    %14 = arith.extf %13 : vector<3x64xbf16> to vector<3x64xf32>
    %c9 = arith.constant 9 : index
    %c0_17 = arith.constant 0 : index
    %15 = vector.load %arg5[%c9, %c0_17] : memref<27x64xf32, #tpu.memory_space<vmem>>, vector<3x64xf32>
    tpu.vector_store %arg5[%c9, %c0_17], %14 {strides = array<i32>} : memref<27x64xf32, #tpu.memory_space<vmem>>, vector<3x64xf32>,
    %c0_18 = arith.constant 0 : index
    %c4 = arith.constant 4 : index
    %c0_19 = arith.constant 0 : index
    %c0_20 = arith.constant 0 : index
    %16 = vector.load %arg3[%c0_18, %c4, %c0_19, %c0_20] : memref<1x6x3x72xbf16, #tpu.memory_space<vmem>>, vector<1x1x3x64xbf16>
    %17 = vector.shape_cast %16 : vector<1x1x3x64xbf16> to vector<3x64xbf16>
    %18 = arith.extf %17 : vector<3x64xbf16> to vector<3x64xf32>
    %c12 = arith.constant 12 : index
    %c0_21 = arith.constant 0 : index
    %19 = vector.load %arg5[%c12, %c0_21] : memref<27x64xf32, #tpu.memory_space<vmem>>, vector<3x64xf32>
    tpu.vector_store %arg5[%c12, %c0_21], %18 {strides = array<i32>} : memref<27x64xf32, #tpu.memory_space<vmem>>, vector<3x64xf32>,
    %c0_22 = arith.constant 0 : index
    %c5 = arith.constant 5 : index
    %c0_23 = arith.constant 0 : index
    %c0_24 = arith.constant 0 : index
    %20 = vector.load %arg3[%c0_22, %c5, %c0_23, %c0_24] : memref<1x6x3x72xbf16, #tpu.memory_space<vmem>>, vector<1x1x3x64xbf16>
    %21 = vector.shape_cast %20 : vector<1x1x3x64xbf16> to vector<3x64xbf16>
    %22 = arith.extf %21 : vector<3x64xbf16> to vector<3x64xf32>
    %c15 = arith.constant 15 : index
    %c0_25 = arith.constant 0 : index
    %23 = vector.load %arg5[%c15, %c0_25] : memref<27x64xf32, #tpu.memory_space<vmem>>, vector<3x64xf32>
    tpu.vector_store %arg5[%c15, %c0_25], %22 {strides = array<i32>} : memref<27x64xf32, #tpu.memory_space<vmem>>, vector<3x64xf32>,
    %c0_26 = arith.constant 0 : index
    %c0_27 = arith.constant 0 : index
    %c0_28 = arith.constant 0 : index
    %c8 = arith.constant 8 : index
    %24 = vector.load %arg3[%c0_26, %c0_27, %c0_28, %c8] : memref<1x6x3x72xbf16, #tpu.memory_space<vmem>>, vector<1x1x3x64xbf16>
    %25 = vector.shape_cast %24 : vector<1x1x3x64xbf16> to vector<3x64xbf16>
    %26 = arith.extf %25 : vector<3x64xbf16> to vector<3x64xf32>
    %c18 = arith.constant 18 : index
    %c0_29 = arith.constant 0 : index
    %27 = vector.load %arg5[%c18, %c0_29] : memref<27x64xf32, #tpu.memory_space<vmem>>, vector<3x64xf32>
    tpu.vector_store %arg5[%c18, %c0_29], %26 {strides = array<i32>} : memref<27x64xf32, #tpu.memory_space<vmem>>, vector<3x64xf32>,
    %c0_30 = arith.constant 0 : index
    %c1_31 = arith.constant 1 : index
    %c0_32 = arith.constant 0 : index
    %c8_33 = arith.constant 8 : index
    %28 = vector.load %arg3[%c0_30, %c1_31, %c0_32, %c8_33] : memref<1x6x3x72xbf16, #tpu.memory_space<vmem>>, vector<1x1x3x64xbf16>
    %29 = vector.shape_cast %28 : vector<1x1x3x64xbf16> to vector<3x64xbf16>
    %30 = arith.extf %29 : vector<3x64xbf16> to vector<3x64xf32>
    %c21 = arith.constant 21 : index
    %c0_34 = arith.constant 0 : index
    %31 = vector.load %arg5[%c21, %c0_34] : memref<27x64xf32, #tpu.memory_space<vmem>>, vector<3x64xf32>
    tpu.vector_store %arg5[%c21, %c0_34], %30 {strides = array<i32>} : memref<27x64xf32, #tpu.memory_space<vmem>>, vector<3x64xf32>,
    %c0_35 = arith.constant 0 : index
    %c2_36 = arith.constant 2 : index
    %c0_37 = arith.constant 0 : index
    %c8_38 = arith.constant 8 : index
    %32 = vector.load %arg3[%c0_35, %c2_36, %c0_37, %c8_38] : memref<1x6x3x72xbf16, #tpu.memory_space<vmem>>, vector<1x1x3x64xbf16>
    %33 = vector.shape_cast %32 : vector<1x1x3x64xbf16> to vector<3x64xbf16>
    %34 = arith.extf %33 : vector<3x64xbf16> to vector<3x64xf32>
    %c24 = arith.constant 24 : index
    %c0_39 = arith.constant 0 : index
    %35 = vector.load %arg5[%c24, %c0_39] : memref<27x64xf32, #tpu.memory_space<vmem>>, vector<3x64xf32>
    tpu.vector_store %arg5[%c24, %c0_39], %34 {strides = array<i32>} : memref<27x64xf32, #tpu.memory_space<vmem>>, vector<3x64xf32>,
    %c0_40 = arith.constant 0 : index
    %c0_41 = arith.constant 0 : index
    %36 = vector.load %arg1[%c0_40, %c0_41] : memref<16x27xf32, #tpu.memory_space<vmem>>, vector<16x27xf32>
    %c0_42 = arith.constant 0 : index
    %c0_43 = arith.constant 0 : index
    %37 = vector.load %arg5[%c0_42, %c0_43] : memref<27x64xf32, #tpu.memory_space<vmem>>, vector<27x64xf32>
    %cst = arith.constant dense<0.000000e+00> : vector<16x64xf32>
    %38 = tpu.matmul %36, %37, %cst {dimension_numbers = #tpu.dot_dimension_numbers<[1], [0], [0], [1], [0, 0, 1, 1], [], []>} : vector<16x27xf32>, vector<27x64xf32>, vector<16x64xf32> -> vector<16x64xf32>
    %c0_44 = arith.constant 0 : index
    %c0_45 = arith.constant 0 : index
    %39 = vector.load %arg2[%c0_44, %c0_45] : memref<16x1xf32, #tpu.memory_space<vmem>>, vector<16x1xf32>
    %40 = vector.broadcast %39 : vector<16x1xf32> to vector<16x64xf32>
    %41 = arith.addf %38, %40 : vector<16x64xf32>
    %cst_46 = arith.constant 0.000000e+00 : f32
    %42 = vector.broadcast %cst_46 : f32 to vector<16x64xf32>
    %43 = arith.cmpf ogt, %41, %42 : vector<16x64xf32>
    %cst_47 = arith.constant 0.00999999977 : f32
    %44 = vector.broadcast %cst_47 : f32 to vector<16x64xf32>
    %45 = arith.mulf %44, %41 : vector<16x64xf32>
    %46 = arith.select %43, %41, %45 : vector<16x64xi1>, vector<16x64xf32>
    %c0_48 = arith.constant 0 : index
    %c0_49 = arith.constant 0 : index
    %c0_50 = arith.constant 0 : index
    %47 = vector.load %arg4[%c0_48, %c0_49, %c0_50] : memref<1x16x64xf32, #tpu.memory_space<vmem>>, vector<1x16x64xf32>
    %48 = vector.shape_cast %47 : vector<1x16x64xf32> to vector<16x64xf32>
    %49 = vector.shape_cast %46 : vector<16x64xf32> to vector<1x16x64xf32>
    tpu.vector_store %arg4[%c0_48, %c0_49, %c0_50], %49 {strides = array<i32>} : memref<1x16x64xf32, #tpu.memory_space<vmem>>, vector<1x16x64xf32>,
    return
  }
  func.func @transform_0(%arg0: i32) -> (i32, i32) {
    %c0_i32 = arith.constant 0 : i32
    %c0_i32_0 = arith.constant 0 : i32
    %c0_i32_1 = arith.constant 0 : i32
    return %c0_i32, %c0_i32_0 : i32, i32
  }
  func.func @transform_1(%arg0: i32) -> (i32, i32) {
    %c0_i32 = arith.constant 0 : i32
    %c0_i32_0 = arith.constant 0 : i32
    %c0_i32_1 = arith.constant 0 : i32
    return %c0_i32, %c0_i32_0 : i32, i32
  }
  func.func @transform_2(%arg0: i32) -> (i32, i32, i32, i32) {
    %c0_i32 = arith.constant 0 : i32
    %c0_i32_0 = arith.constant 0 : i32
    %c0_i32_1 = arith.constant 0 : i32
    %c0_i32_2 = arith.constant 0 : i32
    return %arg0, %c0_i32, %c0_i32_0, %c0_i32_1 : i32, i32, i32, i32
  }
  func.func @transform_3(%arg0: i32) -> (i32, i32, i32) {
    %c0_i32 = arith.constant 0 : i32
    %c0_i32_0 = arith.constant 0 : i32
    %c0_i32_1 = arith.constant 0 : i32
    return %arg0, %c0_i32, %c0_i32_0 : i32, i32, i32
  }
}

</mosaic_0001>

<bundles_post_ra>
// kernel: ae_forward.1
= control target key start
LH: loop header
LB: loop body
LE: loop exit
PB: predicated region body
PF: predicated region fallthrough
CT: control target
= control target key end

     0   :  { %s482_s12 = smov 0   ;;  %s526_s0 = inlined_call_operand.vmem [shape: f32[16,27], index: 0, kind: input, shape index: {}]   ;;  %s527_s1 = inlined_call_operand.vmem [shape: f32[16,1], index: 1, kind: input, shape index: {}]   ;;  %s528_s2 = inlined_call_operand.vmem [shape: bf16[2,6,3,72], index: 2, kind: input, shape index: {}]   ;;  %s529_s3 = inlined_call_operand.vmem [shape: f32[2,16,64], index: 3, kind: output, shape index: {}]  }
   0x1 LB: > { %s384_s13 = sadd.s32 4294967295, %s457_s12   ;;  %p388_p0 = scmp.ge.s32.totalorder %s457_s12, 1  ;;  %s457_s12 = sphi %s482_s12, %s13_s12  }
   0x2   : > { %p137_p1 = scmp.lt.s32.totalorder %s457_s12, 3 }
   0x4   : > { %p138_p2 = pnand %p388_p0, %p137_p1 }
   0x5   : > { %p161_p3 = scmp.lt.s32.totalorder (!%p138_p2), %s384_s13, 1  ;;  %vm173_vm0 = vcmask (!%p138_p2), 518144   ;;  %s459_s18 = smov (!%p138_p2), 120   ;;  %v216_v19 = vld [vmem:[%s526_s0] sm:$0xff] (!%p138_p2)  ;;  %vm234_vm1 = vcmask (!%p138_p2), 220160   ;;  %v460_v22 = vmov (!%p138_p2), 0  }
   0x6   : > { %141 = sbr.rel (%p138_p2) target bundleno = 374 (0x176), region = 32  ;;  %419 = vmatprep.mubr.msk.f32.mxu0 (!%p138_p2), %vm234_vm1, %v216_v19  ;;  %v222_v20 = vld [vmem:[%s527_s1] sm:$0xff] (!%p138_p2)  ;;  %449 = vset.pattern.permute.xlu1 (!%p138_p2), %v460_v22  ;;  %v223_v25 = vld [vmem:[%s527_s1 + $0x8] sm:$0xff] (!%p138_p2)  ;;  %vm241_vm2 = vcmask (!%p138_p2), 1042432   ;;  %vm461_vm3 = vmmov (!%p138_p2), 1   ;;  %vm326_vm6 = vcmask (!%p138_p2), 523264  }
   0x7   : > { %450 = vset.pattern.permute.xlu0 (!%p138_p2), %v460_v22  ;;  %226 = vperm.xlu1 (!%p138_p2), %449, %v222_v20   ;;  %vm427_vm4 = vmpackc.low (!%p138_p2), %vm241_vm2, %vm461_vm3  ;;  %v217_v33 = vld [vmem:[%s526_s0 + $0x8] sm:$0xff] (!%p138_p2) }
   0xb   : > { %231 = vperm.xlu1 (!%p138_p2), %449, %v223_v25  }
   0xd   : > { %s531_s13 = smov (!%p161_p3, %s384_s13), 1 }
   0xe   : > { %s432_s14 = smul.u32 12, %s531_s13  ;;  %s404_s27 = sshll.u32 %s531_s13, 4 }
   0xf   : > { %s170_s30 = scalar_lea.vmem %s529_s3, %s404_s27 }
  0x10   : > { %s165_s17 = scalar_lea.vmem %s528_s2, %s432_s14 }
  0x11   : > { %v195_v0 = vld [vmem:[%s165_s17] sm:$0x3]  ;;  %v397_v1 = vld [vmem:[%s165_s17 + $0x2] sm:$0x3]  ;;  %v398_v2 = vld [vmem:[%s165_s17 + $0x4] sm:$0x3] }
  0x12   : > { %v196_v3 = vunpack.c.l.bf16 %v195_v0  ;;  %v203_v4 = vunpack.c.l.bf16 %v397_v1  ;;  %v171_v5 = vld [vmem:[%s165_s17] sm:$0x3]  ;;  %v392_v6 = vld [vmem:[%s165_s17 + $0x2] sm:$0x3]  ;;  %v393_v7 = vld [vmem:[%s165_s17 + $0x4] sm:$0x3]  ;;  %v210_v18 = vunpack.c.l.bf16 %v398_v2 }
  0x13   : > { %v172_v8 = vunpack.c.l.bf16 %v171_v5  ;;  %v177_v9 = vunpack.c.l.bf16 %v392_v6  ;;  %v181_v10 = vunpack.c.l.bf16 %v393_v7  ;;  %v394_v11 = vld [vmem:[%s165_s17 + $0x6] sm:$0x3]  ;;  %v395_v12 = vld [vmem:[%s165_s17 + $0x8] sm:$0x3]  ;;  %v396_v13 = vld [vmem:[%s165_s17 + $0xa] sm:$0x3] }
  0x14   : > { %v444_v14 = vpack.i.bf16 %v203_v4, %v196_v3  ;;  %v185_v15 = vunpack.c.l.bf16 %v394_v11  ;;  %v189_v16 = vunpack.c.l.bf16 %v395_v12  ;;  %v193_v17 = vunpack.c.l.bf16 %v396_v13 }
  0x15   : > { %174 = vst.msk [vmem:[#allocation2] sm:$0x7] %vm173_vm0, %v172_v8  ;;  %178 = vst.msk [vmem:[#allocation2 + $0x3] sm:$0x7] %vm173_vm0, %v177_v9 }
  0x16   : > { %182 = vst.msk [vmem:[#allocation2 + $0x6] sm:$0x7] %vm173_vm0, %v181_v10  ;;  %445 = vrot.lane.b32.xlu0 %v444_v14, %s459_s18  ;;  %186 = vst.msk [vmem:[#allocation2 + $0x9] sm:$0x7] %vm173_vm0, %v185_v15 }
  0x17   : > { %190 = vst.msk [vmem:[#allocation2 + $0xc] sm:$0x7] %vm173_vm0, %v189_v16  ;;  %194 = vst.msk [vmem:[#allocation2 + $0xf] sm:$0x7] %vm173_vm0, %v193_v17 }
  0x1a   : > { %212 = vrot.lane.b32.xlu0 %v210_v18, %s459_s18 }
  0x1d   : > { %v218_v21 = vld [vmem:[#allocation2] sm:$0xff] }
  0x1e   : > { %v219_v23 = vld [vmem:[#allocation2 + $0x8] sm:$0xff] }
  0x1f   : > { %v422_v24 = vpack.c.bf16 %v219_v23, %v218_v21 }
  0x21   : > { %423 = vmatprep.subr.bf16.mxu0 %v422_v24 }
  0x22   : > { %425 = vmatpush3.bf16.msra.mxu0 %v422_v24 }
  0x86   : > { %v227_v34 = vpop.permute.xlu1 %226 }
  0x88   : > { %v446_v26 = vpop.permute.xlu0 %445 }
  0x89   : > { %v448_v27 = vunpack.i.h.bf16 %v446_v26  ;;  %v447_v28 = vunpack.i.l.bf16 %v446_v26 }
  0x8a   : > { %v232_v35 = vpop.permute.xlu1 %231 }
  0x8b   : > { %208 = vst.msk [vmem:[#allocation2 + $0x15] sm:$0x7] %vm173_vm0, %v448_v27  ;;  %201 = vst.msk [vmem:[#allocation2 + $0x12] sm:$0x7] %vm173_vm0, %v447_v28 }
  0x8c   : > { %v213_v29 = vpop.permute.xlu0 %212 }
  0x8d   : > { %215 = vst.msk [vmem:[#allocation2 + $0x18] sm:$0x7] %vm173_vm0, %v213_v29 }
  0x92   : > { %v220_v30 = vld [vmem:[#allocation2 + $0x10] sm:$0xff] }
  0x94   : > { %v221_v31 = vld [vmem:[#allocation2 + $0x18] sm:$0x7] }
  0x95   : > { %v426_v32 = vpack.c.bf16 %v221_v31, %v220_v30 }
  0x97   : > { %428 = vmatprep.subr.msk.bf16.mxu0 %vm427_vm4, %v426_v32 }
  0x98   : > { %431 = vmatpush3.bf16.msk.msra.mxu0 %vm427_vm4, %v426_v32 }
  0x9b   : > { %420 = vmatmul.mubr.msk.f32.vlgmr.msra.gmra.mrb[0].mxu0 %vm234_vm1, %v217_v33 }
 0x16e   : > { %v421_v36 = vpop.f32.mrb[0].mxu0 }
 0x16f   : > { %v317_v37 = vadd.f32 %v421_v36, %v232_v35  ;;  %v311_v38 = vpop.f32.mrb[1].mxu0 }
 0x170   : > { %v312_v39 = vadd.f32 %v311_v38, %v227_v34 }
 0x171   : > { %vm321_vm5 = vcmp.gt.f32.partialorder %v317_v37, 0.0  ;;  %v323_v40 = vmul.f32 0.01, %v317_v37 }
 0x172   : > { %vm320_vm7 = vcmp.gt.f32.partialorder %v312_v39, 0.0  ;;  %v322_v41 = vmul.f32 0.01, %v312_v39 }
 0x173   : > { %v325_v42 = vsel %vm321_vm5, %v317_v37, %v323_v40 }
 0x174   : > { %328 = vst.msk [vmem:[%s170_s30 + $0x8] sm:$0xff] %vm326_vm6, %v325_v42  ;;  %v324_v43 = vsel %vm320_vm7, %v312_v39, %v322_v41 }
 0x175   : > { %327 = vst.msk [vmem:[%s170_s30] sm:$0xff] %vm326_vm6, %v324_v43 }
 0x176 PF: > { %s13_s12 = sadd.s32 1, %s457_s12  }
 0x177   : > { %p10_p4 = scmp.ge.s32.totalorder %s13_s12, 4  }
 0x179   :  { %12 = sbr.rel (!%p10_p4) target bundleno = 1 (0x1), region = 67 }

</bundles_post_ra>
